<compile_context>
chip_gen: v7x
topology: tpu7x:2x2x1
jax: 0.10.0
libtpu: 0.0.40
codegen_flags: <defaults>
</compile_context>

<pallas_src>
import jax
import jax.numpy as jnp
from jax.experimental import pallas as pl
from jax.experimental.pallas import tpu as pltpu


def _round_up(x, m):
    return ((x + m - 1) // m) * m


def value_net_kernel(x_ref, w1_ref, b1_ref, w2_ref, b2_ref, out_ref):
    # Layer 1 on the MXU, f32 in / f32 accumulate: (TB, S) @ (S, H) -> (TB, H).
    h = jnp.dot(x_ref[...], w1_ref[...], preferred_element_type=jnp.float32)
    h = jnp.maximum(h + b1_ref[...], 0.0)                       # bias + ReLU (f32, VPU; v5e-safe)
    # Layer 2 as the MXU-native A @ B^T contraction (same pattern as q.k^T in flash attention):
    # (1, H) x (TB, H) contracted over H -> (1, TB).  h is consumed in its natural (TB, H)
    # layout (no XLU vxpose) and the result is lane-dense (batch on lanes).
    v = jax.lax.dot_general(
        w2_ref[...], h,
        dimension_numbers=(((1,), (1,)), ((), ())),
        preferred_element_type=jnp.float32,
    )
    out_ref[...] = (v + b2_ref[0, 0]).astype(out_ref.dtype)      # scalar bias read from SMEM


def value_net_forward(state, w1, b1, w2, b2, *, block_b=16384, small_batch_threshold=256):
    """state: (B, state_dim) f32 -> (B,) f32.  Matches ValueNet.forward (incl. squeeze(-1)).

    Parameter layout (JAX-side):
      w1: (state_dim, hidden)   b1: (1, hidden)
      w2: (1, hidden)           b2: (1, 1)

    block_b: max rows per grid step (multiple of 128).  16384 ~= 6 MiB working set (safe on
    v5e's 16 MiB scoped-VMEM default); sweep 8192-32768 on v6e/v7x.
    """
    B, S = state.shape
    H = w1.shape[1]
    assert w1.shape == (S, H) and b1.shape == (1, H) and w2.shape == (1, H) and b2.shape == (1, 1)
    assert block_b % 128 == 0, "block_b must be a multiple of 128 (lane-dense output blocks)"

    if state.dtype != jnp.float32:
        state = state.astype(jnp.float32)   # no-op for the expected f32 input

    if B <= small_batch_threshold:
        # Tiny batch: single block that equals the full arrays -> no (8,128) divisibility
        # constraint, no padding anywhere.
        tb = B
        num_tiles = 1
        b_padded = B
    else:
        # Tiled path: tile is a multiple of 128 (lane-dense output blocks), at least 2 tiles
        # (feeds both TensorCores on v7x via the "parallel" axis), capped at block_b.
        tb = min(block_b, _round_up(pl.cdiv(B, 2), 128))
        num_tiles = pl.cdiv(B, tb)
        b_padded = num_tiles * tb
        # Input stays un-padded: the last (ragged) input block reads garbage past row B, but the
        # computation is row-independent, and only output lanes >= B (sliced off below) see it.

    out = pl.pallas_call(
        value_net_kernel,
        out_shape=jax.ShapeDtypeStruct((1, b_padded), jnp.float32),
        grid=(num_tiles,),
        in_specs=[
            pl.BlockSpec((tb, S), lambda i: (i, 0)),              # activations: one tile / step
            pl.BlockSpec((S, H), lambda i: (0, 0)),               # W1: VMEM-resident
            pl.BlockSpec((1, H), lambda i: (0, 0)),               # b1: VMEM-resident
            pl.BlockSpec((1, H), lambda i: (0, 0)),               # w2 row: VMEM-resident
            pl.BlockSpec(memory_space=pltpu.MemorySpace.SMEM),    # b2: scalar in SMEM
        ],
        out_specs=pl.BlockSpec((1, tb), lambda i: (0, i)),        # lane-dense: batch on lanes
        compiler_params=pltpu.CompilerParams(
            dimension_semantics=("parallel",),
        ),
    )(state, w1, b1, w2, b2)
    return out[0, :B]


def init_params(key, state_dim, hidden):
    """Deterministic init mimicking nn.Linear default (uniform +/- 1/sqrt(fan_in))."""
    k1, k2, k3, k4 = jax.random.split(key, 4)
    bound1 = 1.0 / jnp.sqrt(state_dim)
    bound2 = 1.0 / jnp.sqrt(hidden)
    w1 = jax.random.uniform(k1, (state_dim, hidden), jnp.float32, -bound1, bound1)  # (in, out)
    b1 = jax.random.uniform(k2, (1, hidden), jnp.float32, -bound1, bound1)
    w2 = jax.random.uniform(k3, (1, hidden), jnp.float32, -bound2, bound2)          # torch (out=1, in)
    b2 = jax.random.uniform(k4, (1, 1), jnp.float32, -bound2, bound2)
    return w1, b1, w2, b2


def reference_forward(state, w1, b1, w2, b2):
    """Plain-JAX f32 reference (nn.Linear semantics)."""
    hp = jax.lax.Precision.HIGHEST
    h = jnp.dot(state, w1, preferred_element_type=jnp.float32, precision=hp) + b1
    h = jnp.maximum(h, 0.0)
    v = jnp.dot(h, w2.T, preferred_element_type=jnp.float32, precision=hp) + b2   # (B, 1)
    return v[:, 0]


if __name__ == "__main__":
    STATE_DIM, HIDDEN = 16, 64  # hidden=64 matches the module default

    key = jax.random.PRNGKey(0)
    k_params, k_state = jax.random.split(key)
    w1, b1, w2, b2 = init_params(k_params, STATE_DIM, HIDDEN)

    # 1) Small batch -> single-tile path (block == full array, no padding anywhere).
    B_small = 8
    state_small = jax.random.normal(jax.random.fold_in(k_state, 0),
                                    (B_small, STATE_DIM), jnp.float32)
    out_small = value_net_forward(state_small, w1, b1, w2, b2)
    jax.block_until_ready(out_small)
    ref_small = reference_forward(state_small, w1, b1, w2, b2)
    assert out_small.shape == (B_small,)
    assert jnp.allclose(out_small, ref_small, atol=1e-3, rtol=1e-3)

    # 2) Larger batch -> tiled path: B=700, tb=384 (>=2 tiles, both TCs on v7x), grid=(2,),
    #    un-padded ragged last input block, output allocation padded to 768 then sliced.
    B_big = 700
    state_big = jax.random.normal(jax.random.fold_in(k_state, 1),
                                  (B_big, STATE_DIM), jnp.float32)
    out_big = value_net_forward(state_big, w1, b1, w2, b2)
    jax.block_until_ready(out_big)
    ref_big = reference_forward(state_big, w1, b1, w2, b2)
    assert out_big.shape == (B_big,)
    assert jnp.allclose(out_big, ref_big, atol=1e-3, rtol=1e-3)

    print("KERNEL_OK")
</pallas_src>

<mosaic_0001>
module attributes {stable_mosaic.version = 11 : i64} {
  func.func @value_net_kernel(%arg0: i32, %arg1: memref<8x16xf32, #tpu.memory_space<vmem>>, %arg2: memref<16x64xf32, #tpu.memory_space<vmem>>, %arg3: memref<1x64xf32, #tpu.memory_space<vmem>>, %arg4: memref<1x64xf32, #tpu.memory_space<vmem>>, %arg5: memref<1x1xf32, #tpu.memory_space<smem>>, %arg6: memref<1x8xf32, #tpu.memory_space<vmem>>) attributes {dimension_semantics = [#tpu.dimension_semantics<parallel>], iteration_bounds = array<i64: 1>, scalar_prefetch = 0 : i64, scratch_operands = 0 : i64, tpu.core_type = #tpu.core_type<tc>, window_params = [{transform_indices = @transform_0, window_bounds = array<i64: 8, 16>}, {pipeline_mode = #tpu.pipeline_mode<synchronous>, transform_indices = @transform_1, window_bounds = array<i64: 16, 64>}, {pipeline_mode = #tpu.pipeline_mode<synchronous>, transform_indices = @transform_2, window_bounds = array<i64: 1, 64>}, {pipeline_mode = #tpu.pipeline_mode<synchronous>, transform_indices = @transform_3, window_bounds = array<i64: 1, 64>}, {transform_indices = @transform_4, window_bounds = array<i64: 1, 1>}, {transform_indices = @transform_5, window_bounds = array<i64: 1, 8>}]} {
    %c0 = arith.constant 0 : index
    %c0_0 = arith.constant 0 : index
    %0 = vector.load %arg1[%c0, %c0_0] : memref<8x16xf32, #tpu.memory_space<vmem>>, vector<8x16xf32>
    %c0_1 = arith.constant 0 : index
    %c0_2 = arith.constant 0 : index
    %1 = vector.load %arg2[%c0_1, %c0_2] : memref<16x64xf32, #tpu.memory_space<vmem>>, vector<16x64xf32>
    %cst = arith.constant dense<0.000000e+00> : vector<8x64xf32>
    %2 = tpu.matmul %0, %1, %cst {dimension_numbers = #tpu.dot_dimension_numbers<[1], [0], [0], [1], [0, 0, 1, 1], [], []>} : vector<8x16xf32>, vector<16x64xf32>, vector<8x64xf32> -> vector<8x64xf32>
    %c0_3 = arith.constant 0 : index
    %c0_4 = arith.constant 0 : index
    %3 = vector.load %arg3[%c0_3, %c0_4] : memref<1x64xf32, #tpu.memory_space<vmem>>, vector<1x64xf32>
    %4 = vector.broadcast %3 : vector<1x64xf32> to vector<8x64xf32>
    %5 = arith.addf %2, %4 : vector<8x64xf32>
    %cst_5 = arith.constant 0.000000e+00 : f32
    %6 = vector.broadcast %cst_5 : f32 to vector<8x64xf32>
    %7 = arith.maximumf %5, %6 : vector<8x64xf32>
    %c0_6 = arith.constant 0 : index
    %c0_7 = arith.constant 0 : index
    %8 = vector.load %arg4[%c0_6, %c0_7] : memref<1x64xf32, #tpu.memory_space<vmem>>, vector<1x64xf32>
    %cst_8 = arith.constant dense<0.000000e+00> : vector<1x8xf32>
    %9 = tpu.matmul %8, %7, %cst_8 {dimension_numbers = #tpu.dot_dimension_numbers<[1], [1], [0], [0], [0, 0, 1, 0], [], []>} : vector<1x64xf32>, vector<8x64xf32>, vector<1x8xf32> -> vector<1x8xf32>
    %c0_9 = arith.constant 0 : index
    %c0_10 = arith.constant 0 : index
    %10 = memref.load %arg5[%c0_9, %c0_10] : memref<1x1xf32, #tpu.memory_space<smem>>
    %11 = vector.broadcast %10 : f32 to vector<1x8xf32>
    %12 = arith.addf %9, %11 : vector<1x8xf32>
    %c0_11 = arith.constant 0 : index
    %c0_12 = arith.constant 0 : index
    %13 = vector.load %arg6[%c0_11, %c0_12] : memref<1x8xf32, #tpu.memory_space<vmem>>, vector<1x8xf32>
    tpu.vector_store %arg6[%c0_11, %c0_12], %12 {strides = array<i32>} : memref<1x8xf32, #tpu.memory_space<vmem>>, vector<1x8xf32>,
    return
  }
  func.func @transform_0(%arg0: i32) -> (i32, i32) {
    %c0_i32 = arith.constant 0 : i32
    %c0_i32_0 = arith.constant 0 : i32
    return %arg0, %c0_i32 : i32, i32
  }
  func.func @transform_1(%arg0: i32) -> (i32, i32) {
    %c0_i32 = arith.constant 0 : i32
    %c0_i32_0 = arith.constant 0 : i32
    %c0_i32_1 = arith.constant 0 : i32
    return %c0_i32, %c0_i32_0 : i32, i32
  }
  func.func @transform_2(%arg0: i32) -> (i32, i32) {
    %c0_i32 = arith.constant 0 : i32
    %c0_i32_0 = arith.constant 0 : i32
    %c0_i32_1 = arith.constant 0 : i32
    return %c0_i32, %c0_i32_0 : i32, i32
  }
  func.func @transform_3(%arg0: i32) -> (i32, i32) {
    %c0_i32 = arith.constant 0 : i32
    %c0_i32_0 = arith.constant 0 : i32
    %c0_i32_1 = arith.constant 0 : i32
    return %c0_i32, %c0_i32_0 : i32, i32
  }
  func.func @transform_4(%arg0: i32) -> (i32, i32) {
    %c0_i32 = arith.constant 0 : i32
    %c0_i32_0 = arith.constant 0 : i32
    %c0_i32_1 = arith.constant 0 : i32
    return %c0_i32, %c0_i32_0 : i32, i32
  }
  func.func @transform_5(%arg0: i32) -> (i32, i32) {
    %c0_i32 = arith.constant 0 : i32
    %c0_i32_0 = arith.constant 0 : i32
    return %c0_i32, %arg0 : i32, i32
  }
}

</mosaic_0001>

<bundles_post_ra>
// kernel: tpu_custom_call.1
= control target key start
LH: loop header
LB: loop body
LE: loop exit
PB: predicated region body
PF: predicated region fallthrough
CT: control target
= control target key end

     0   :  { %11 = vsyncpa [#allocation4], 0  ;;  %s425_s0 = inlined_call_operand.hbm [shape: f32[8,16], index: 0, kind: input, shape index: {}]   ;;  %s426_s1 = inlined_call_operand.hbm [shape: f32[16,64], index: 1, kind: input, shape index: {}]   ;;  %s427_s2 = inlined_call_operand.vmem [shape: f32[1,64], index: 2, kind: input, shape index: {}]   ;;  %s428_s3 = inlined_call_operand.vmem [shape: f32[1,64], index: 3, kind: input, shape index: {}]   ;;  %s429_s4 = inlined_call_operand.<no memory space> [shape: f32[1,1], index: 4, kind: input, shape index: {}]   ;;  %s430_s5 = inlined_call_operand.hbm [shape: f32[1,8], index: 5, kind: output, shape index: {}]  }
   0x1   :  { %12 = vsyncpa [#allocation7], 0 }
   0x2   :  { %13 = vsyncpa [#allocation5], 0  ;;  %s335_s18 = smov [#allocation3]   ;;  %s336_s20 = smov [#allocation6]  }
   0x3   :  { %s20_s19 = sshll.u32 %s335_s18, 4  ;;  %s29_s21 = sshll.u32 %s336_s20, 4  ;;  %s21_s19 = int_to_ptr.vmem [resolvable:$true] %s20_s19  ;;  %s373_s21 = int_to_ptr.vmem [resolvable:$true] %s29_s21 }
   0x4   :  { %s263_s24 = scalar_lea.hbm %s425_s0, 128 }
   0x5   :  { %p264_p0 = scmp.ne.s32.totalorder %s425_s0, %s263_s24  ;;  %p267_p1 = scmp.lt.u32.totalorder %s263_s24, %s425_s0 }
   0x7   :  { %p269_p2 = pnand %p267_p1, %p264_p0 }
   0x9   :  { %272 = shalt.err (!%p269_p2)
}
   0xa   :  { %s273_s29 = scalar_lea.vmem %s21_s19, 128  ;;  %p278_p4 = scmp.lt.s32.totalorder %s21_s19, %s21_s19 }
   0xb   :  { %p274_p3 = scmp.ne.s32.totalorder %s21_s19, %s273_s29  ;;  %p279_p5 = scmp.lt.s32.totalorder %s273_s29, %s273_s29 }
   0xd   :  { %p280_p6 = por %p279_p5, %p278_p4 }
   0xf   :  { %p281_p7 = pnand %p280_p6, %p274_p3 }
  0x11   :  { %284 = shalt.err (!%p281_p7)
}
  0x12   :  { %23 = dma.hbm_to_vmem [thread:$0]  %s425_s0, 128, %s21_s19, [#allocation4]  }
  0x13   :  { %s285_s9 = scalar_lea.hbm %s426_s1, 256 }
  0x14   :  { %p286_p8 = scmp.ne.s32.totalorder %s426_s1, %s285_s9  ;;  %p289_p9 = scmp.lt.u32.totalorder %s285_s9, %s426_s1 }
  0x16   :  { %p291_p10 = pnand %p289_p9, %p286_p8 }
  0x18   :  { %294 = shalt.err (!%p291_p10)
}
  0x19   :  { %s295_s14 = scalar_lea.vmem %s373_s21, 256  ;;  %p300_p12 = scmp.lt.s32.totalorder %s373_s21, %s373_s21 }
  0x1a   :  { %p296_p11 = scmp.ne.s32.totalorder %s373_s21, %s295_s14  ;;  %p301_p13 = scmp.lt.s32.totalorder %s295_s14, %s295_s14 }
  0x1c   :  { %p302_p0 = por %p301_p13, %p300_p12 }
  0x1e   :  { %p303_p1 = pnand %p302_p0, %p296_p11 }
  0x20   :  { %306 = shalt.err (!%p303_p1)
}
  0x21   :  { %s337_s0 = smov 128   ;;  %s338_s15 = smov 8  }
  0x22   :  { %35 = dma.hbm_to_vmem [thread:$0]  %s426_s1, 256, %s373_s21, [#allocation7], %s337_s0, %s337_s0, %s338_s15  }
  0x23   :  { %329 = dma.done.wait [#allocation4], 128  }
  0x24   :  { %330 = vsyncadd [#allocation4], 4294967168 }
  0x25   :  { %331 = dma.done.wait [#allocation7], 256  }
  0x26   :  { %332 = vsyncadd [#allocation7], 4294967040  ;;  %v339_v0 = vmov 0.0|0.0   ;;  %vm340_vm0 = vmmov 0   ;;  %v341_v1 = vmov 0.0   ;;  %v49_v2 = vld [vmem:[#allocation6] sm:$0xff]  ;;  %v135_v12 = vstv %s429_s4 }
  0x27   :  { %252 = vmatprep.subr.bf16.mxu0 %v339_v0  ;;  %244 = vmatprep.mubr.msk.f32.mxu0 %vm340_vm0, %v341_v1  ;;  %v50_v3 = vld [vmem:[#allocation6 + $0x8] sm:$0xff]  ;;  %v48_v5 = vld [vmem:[#allocation3] sm:$0xff]  ;;  %vm58_vm1 = vcmask 130048   ;;  %vm136_vm2 = vcmask 523264   ;;  %s342_s23 = smov [#allocation8]   ;;  %vm213_vm3 = vcmask 57344  }
  0x28   :  { %247 = vmatprep.subr.mxu1 %v341_v1  ;;  %249 = vmatprep.mubr.msk.f32.mxu1 %vm340_vm0, %v341_v1  ;;  %v253_v4 = vpack.c.bf16 %v50_v3, %v49_v2  ;;  %v231_v6 = vld [vmem:[%s427_s2] ss:$0 sm:$0xff]  ;;  %s221_s24 = sshll.u32 %s342_s23, 4  ;;  %s222_s24 = int_to_ptr.vmem [resolvable:$true] %s221_s24 }
  0x29   :  { %v133_v11 = vld [vmem:[%s428_s3] sm:$0x1]  ;;  %s307_s2 = scalar_lea.vmem %s222_s24, 16  ;;  %s311_s25 = scalar_lea.vmem %s222_s24, 32 }
  0x2a   :  { %254 = vmatpush3.bf16.msra.mxu0 %v253_v4  ;;  %p308_p2 = scmp.ne.s32.totalorder %s222_s24, %s307_s2  ;;  %p312_p3 = scmp.lt.s32.totalorder %s222_s24, %s222_s24 }
  0x2b   :  { %p313_p4 = scmp.lt.s32.totalorder %s311_s25, %s307_s2 }
  0x2d   :  { %245 = vmatmul.mubr.msk.f32.vlgmr.msra.gmra.mrb[0].mxu0 %vm58_vm1, %v48_v5  ;;  %p314_p5 = por %p313_p4, %p312_p3 }
  0x2f   :  { %p315_p6 = pnand %p314_p5, %p308_p2 }
 0x100   :  { %v128_v7 = vpop.f32.mrb[0].mxu0 }
 0x101   :  { %v129_v8 = vadd.f32 %v231_v6, %v128_v7  ;;  %v246_v9 = vpop.f32.mrb[1].mxu0 }
 0x103   :  { %v132_v10 = vmax.f32 %v129_v8, 0.0 }
 0x105   :  { %248 = vmatpush3.xpose.msk.msra.mxu1 %vm136_vm2, %v132_v10 }
 0x108   :  { %250 = vmatmul.mubr.msk.f32.vlgmr.msra.gmra.mrb[0].mxu1 %vm136_vm2, %v133_v11 }
 0x1db   :  { %v209_v13 = vpop.f32.mrb[0].mxu1 }
 0x1dc   :  { %v210_v14 = vadd.f32 %v209_v13, %v135_v12  ;;  %v251_v15 = vpop.f32.mrb[1].mxu1 }
 0x1de   :  { %214 = vst.msk [vmem:[#allocation8] sm:$0x1] %vm213_vm3, %v210_v14 }
 0x1df   :  { %318 = shalt.err (!%p315_p6)
}
 0x1e0   :  { %s319_s4 = scalar_lea.hbm %s430_s5, 16 }
 0x1e1   :  { %p320_p7 = scmp.ne.s32.totalorder %s430_s5, %s319_s4  ;;  %p323_p8 = scmp.lt.u32.totalorder %s319_s4, %s430_s5 }
 0x1e3   :  { %p325_p9 = pnand %p323_p8, %p320_p7 }
 0x1e5   :  { %328 = shalt.err (!%p325_p9)
}
 0x1e6   :  { %224 = dma.vmem_to_hbm [thread:$0]  %s222_s24, 16, %s430_s5, [#allocation5]  }
 0x1e7   :  { %333 = dma.done.wait [#allocation5], 16  }
 0x1e8   :  { %334 = vsyncadd [#allocation5], 4294967280 }
 0x1e9   :  { %228 = vsyncpa [#allocation4], 1 }
 0x1ea   :  { %229 = vsyncpa [#allocation7], 1 }
 0x1eb   :  { %230 = vsyncpa [#allocation5], 1 }

</bundles_post_ra>
